<compile_context>
chip_gen: v7x
topology: tpu7x:2x2x1
jax: 0.10.0
libtpu: 0.0.40
codegen_flags: <defaults>
</compile_context>

<pallas_src>
import functools
import math

import jax
import jax.numpy as jnp
from jax.experimental import pallas as pl
from jax.experimental.pallas import tpu as pltpu


# ----------------------------------------------------------------------------
# Kernel 1: fused 3x3 conv (pad=1, stride=1) + bias + ReLU [+ 2x2 max pool]
# One grid step = one batch element (NHWC). The conv is a single im2col MXU
# matmul; the halo is built in a f32 VMEM scratch (zero border, interior
# copied from the bf16 input block).
# ----------------------------------------------------------------------------
def _conv3x3_relu_kernel(x_ref, w_ref, b_ref, o_ref, pad_ref, *, pool):
    H, W, Cin = x_ref.shape[1], x_ref.shape[2], x_ref.shape[3]
    Cout = o_ref.shape[3]

    # Build the 1-pixel zero halo in VMEM (no wrapper-side jnp.pad / HBM pass).
    # Zeroing the whole (H+2, W+2, Cin) scratch is only a handful of vregs at
    # these sizes; the interior is overwritten right after.
    pad_ref[...] = jnp.zeros_like(pad_ref)
    pad_ref[1:H + 1, 1:W + 1, :] = x_ref[0].astype(jnp.float32)

    # im2col: 9 shifted windows concatenated along the channel (lane) axis.
    taps = [pad_ref[kh:kh + H, kw:kw + W, :]
            for kh in range(3) for kw in range(3)]
    patches = jnp.concatenate(taps, axis=-1).reshape(H * W, 9 * Cin)

    # Single MXU matmul, bf16 operands, f32 accumulation.
    acc = jnp.dot(patches.astype(jnp.bfloat16), w_ref[...],
                  preferred_element_type=jnp.float32)
    out = jnp.maximum(acc + b_ref[...], 0.0)           # (H*W, Cout), f32

    if pool:
        # Fused 2x2 max pool (rows of `out` are (h, w) row-major).
        t = out.reshape(H, W // 2, 2, Cout)
        t = jnp.max(t, axis=2)                         # pool along W
        t = t.reshape(H // 2, 2, W // 2, Cout)
        t = jnp.max(t, axis=1)                         # pool along H
        o_ref[0] = t.astype(o_ref.dtype)
    else:
        o_ref[0] = out.reshape(H, W, Cout).astype(o_ref.dtype)


def conv3x3_relu(x_nhwc, w9_bf16, b, *, pool):
    N, H, W, Cin = x_nhwc.shape
    Cout = w9_bf16.shape[-1]
    if pool:
        assert H % 2 == 0 and W % 2 == 0
    Ho, Wo = (H // 2, W // 2) if pool else (H, W)

    kernel = functools.partial(_conv3x3_relu_kernel, pool=pool)
    return pl.pallas_call(
        kernel,
        out_shape=jax.ShapeDtypeStruct((N, Ho, Wo, Cout), jnp.bfloat16),
        grid_spec=pltpu.PrefetchScalarGridSpec(
            num_scalar_prefetch=0,
            grid=(N,),
            in_specs=[
                pl.BlockSpec((1, H, W, Cin), lambda n: (n, 0, 0, 0)),
                pl.BlockSpec((9 * Cin, Cout), lambda n: (0, 0)),
                pl.BlockSpec((1, Cout), lambda n: (0, 0)),
            ],
            out_specs=pl.BlockSpec((1, Ho, Wo, Cout), lambda n: (n, 0, 0, 0)),
            scratch_shapes=[pltpu.VMEM((H + 2, W + 2, Cin), jnp.float32)],
        ),
        # Batch is the leading (only) grid axis and marked parallel so the two
        # v7x TensorCores split it. For realistic VGG sizes a spatial grid
        # axis + explicit vmem_limit_bytes would be added here.
        compiler_params=pltpu.CompilerParams(
            dimension_semantics=("parallel",)),
    )(x_nhwc, w9_bf16, b)


# ----------------------------------------------------------------------------
# Kernel 2: fused classifier  (Dropout=id) Linear->ReLU->(Dropout=id)
#           Linear->ReLU->Linear.  Output padded to 128 lanes (lane-dense).
# ----------------------------------------------------------------------------
def _classifier_kernel(x_ref, w1_ref, b1_ref, w2_ref, b2_ref, w3_ref, b3_ref,
                       o_ref):
    h = jnp.dot(x_ref[...].astype(jnp.bfloat16), w1_ref[...],
                preferred_element_type=jnp.float32) + b1_ref[...]
    h = jnp.maximum(h, 0.0)
    h = jnp.dot(h.astype(jnp.bfloat16), w2_ref[...],
                preferred_element_type=jnp.float32) + b2_ref[...]
    h = jnp.maximum(h, 0.0)
    o = jnp.dot(h.astype(jnp.bfloat16), w3_ref[...],
                preferred_element_type=jnp.float32) + b3_ref[...]
    o_ref[...] = o.astype(o_ref.dtype)


def classifier(x_flat, w1, b1, w2, b2, w3_pad, b3_pad):
    N = x_flat.shape[0]
    Cpad = w3_pad.shape[-1]
    return pl.pallas_call(
        _classifier_kernel,
        out_shape=jax.ShapeDtypeStruct((N, Cpad), jnp.float32),
    )(x_flat, w1, b1, w2, b2, w3_pad, b3_pad)


# ----------------------------------------------------------------------------
# VGGBase forward (NCHW input, logits output)
# ----------------------------------------------------------------------------
def vgg_forward(x_nchw, kparams, config, num_classes):
    x = jnp.transpose(x_nchw, (0, 2, 3, 1)).astype(jnp.bfloat16)  # NCHW->NHWC
    li = 0
    for block in config:
        for j, _ in enumerate(block):
            last = (j == len(block) - 1)                # pool after the block
            x = conv3x3_relu(x, kparams["conv_w9"][li], kparams["conv_b"][li],
                             pool=last)
            li += 1
    # PyTorch flattens NCHW (x.view(N, -1)); fc1 rows were pre-permuted to the
    # (H, W, C) order, so a plain reshape of the NHWC output suffices here.
    n = x.shape[0]
    feat = x.reshape(n, -1)
    logits = classifier(feat,
                        kparams["fc1_w"], kparams["fc1_b"],
                        kparams["fc2_w"], kparams["fc2_b"],
                        kparams["fc3_w"], kparams["fc3_b"])
    return logits[:, :num_classes]


# ----------------------------------------------------------------------------
# Parameter init (PyTorch-style) and one-time kernel-layout preparation.
# ----------------------------------------------------------------------------
def init_params(key, config, num_classes):
    params = {"conv_w_hwio": [], "conv_b": []}
    keys = iter(jax.random.split(key, 64))
    in_c = 3
    for block in config:
        for out_c in block:
            n = 3 * 3 * out_c                           # module's init: N(0, sqrt(2/n))
            w = jax.random.normal(next(keys), (3, 3, in_c, out_c), jnp.float32)
            params["conv_w_hwio"].append(w * math.sqrt(2.0 / n))
            params["conv_b"].append(jnp.zeros((1, out_c), jnp.float32))
            in_c = out_c

    def linear(k, fan_in, fan_out):
        kw, kb = jax.random.split(k)
        bound = 1.0 / math.sqrt(fan_in)                 # nn.Linear default init
        w = jax.random.uniform(kw, (fan_in, fan_out), jnp.float32, -bound, bound)
        b = jax.random.uniform(kb, (1, fan_out), jnp.float32, -bound, bound)
        return w, b

    params["fc1_w"], params["fc1_b"] = linear(next(keys), 512, 512)
    params["fc2_w"], params["fc2_b"] = linear(next(keys), 512, 512)
    params["fc3_w"], params["fc3_b"] = linear(next(keys), 512, num_classes)
    return params


def prepare_kernel_params(params, config, num_classes, in_hw, lane=128):
    """One-time weight prep: im2col reshape, bf16 cast, fc1 row permutation
    (PyTorch (C,H,W) flatten order -> kernel (H,W,C) order), lane-pad fc3."""
    kp = {"conv_w9": [], "conv_b": []}
    for w, b in zip(params["conv_w_hwio"], params["conv_b"]):
        _, _, cin, cout = w.shape
        kp["conv_w9"].append(w.reshape(9 * cin, cout).astype(jnp.bfloat16))
        kp["conv_b"].append(b)

    hf = in_hw[0] // (2 ** len(config))
    wf = in_hw[1] // (2 ** len(config))
    cf = config[-1][-1]
    assert cf * hf * wf == 512, "flattened feature must be 512 (module spec)"
    w1 = params["fc1_w"].reshape(cf, hf, wf, 512)
    w1 = jnp.transpose(w1, (1, 2, 0, 3)).reshape(512, 512)
    kp["fc1_w"] = w1.astype(jnp.bfloat16)
    kp["fc1_b"] = params["fc1_b"]
    kp["fc2_w"] = params["fc2_w"].astype(jnp.bfloat16)
    kp["fc2_b"] = params["fc2_b"]

    cpad = ((num_classes + lane - 1) // lane) * lane
    w3 = jnp.zeros((params["fc3_w"].shape[0], cpad), jnp.float32)
    w3 = w3.at[:, :num_classes].set(params["fc3_w"])
    b3 = jnp.zeros((1, cpad), jnp.float32).at[:, :num_classes].set(
        params["fc3_b"])
    kp["fc3_w"] = w3.astype(jnp.bfloat16)
    kp["fc3_b"] = b3
    return kp


# ----------------------------------------------------------------------------
# Plain-JAX f32 reference (XLA conv) for a correctness check.
# ----------------------------------------------------------------------------
def reference_forward(x_nchw, params, config):
    x = jnp.transpose(x_nchw, (0, 2, 3, 1))
    li = 0
    for block in config:
        for _ in block:
            w = params["conv_w_hwio"][li]
            b = params["conv_b"][li]
            x = jax.lax.conv_general_dilated(
                x, w, window_strides=(1, 1), padding=((1, 1), (1, 1)),
                dimension_numbers=("NHWC", "HWIO", "NHWC"))
            x = jnp.maximum(x + b[0], 0.0)
            li += 1
        n, h, ww, c = x.shape
        x = x.reshape(n, h // 2, 2, ww // 2, 2, c).max(axis=(2, 4))
    feat = jnp.transpose(x, (0, 3, 1, 2)).reshape(x.shape[0], -1)
    h1 = jnp.maximum(feat @ params["fc1_w"] + params["fc1_b"][0], 0.0)
    h2 = jnp.maximum(h1 @ params["fc2_w"] + params["fc2_b"][0], 0.0)
    return h2 @ params["fc3_w"] + params["fc3_b"][0]


if __name__ == "__main__":
    # Small VGG-style config: 2 blocks of one conv each, channels chosen as a
    # multiple of 128 (lane-dense MXU output) and so the flattened feature is
    # exactly 512 = 128 * 2 * 2, matching the module's hard-coded classifier.
    config = ((128,), (128,))
    num_classes = 10
    N, H, W = 2, 8, 8

    key = jax.random.PRNGKey(0)
    kx, kp = jax.random.split(key)
    x_nchw = jax.random.normal(kx, (N, 3, H, W), jnp.float32)

    params = init_params(kp, config, num_classes)
    kparams = prepare_kernel_params(params, config, num_classes, (H, W))

    out = vgg_forward(x_nchw, kparams, config, num_classes)
    out = jax.block_until_ready(out)
    assert out.shape == (N, num_classes)

    ref = reference_forward(x_nchw, params, config)
    if not jnp.allclose(out, ref, atol=3e-2, rtol=3e-2):
        err = float(jnp.max(jnp.abs(out - ref)))
        raise AssertionError(f"Pallas output mismatches reference, max err {err}")

    print("KERNEL_OK")
</pallas_src>

<mosaic_0001>
module attributes {stable_mosaic.version = 11 : i64} {
  func.func @_conv3x3_relu_kernel(%arg0: i32, %arg1: memref<1x8x8x3xbf16, #tpu.memory_space<vmem>>, %arg2: memref<27x128xbf16, #tpu.memory_space<vmem>>, %arg3: memref<1x128xf32, #tpu.memory_space<vmem>>, %arg4: memref<1x4x4x128xbf16, #tpu.memory_space<vmem>>, %arg5: memref<10x10x3xf32, #tpu.memory_space<vmem>>) attributes {dimension_semantics = [#tpu.dimension_semantics<parallel>], iteration_bounds = array<i64: 2>, scalar_prefetch = 0 : i64, scratch_operands = 1 : i64, tpu.core_type = #tpu.core_type<tc>, window_params = [{transform_indices = @transform_0, window_bounds = array<i64: 1, 8, 8, 3>}, {pipeline_mode = #tpu.pipeline_mode<synchronous>, transform_indices = @transform_1, window_bounds = array<i64: 27, 128>}, {pipeline_mode = #tpu.pipeline_mode<synchronous>, transform_indices = @transform_2, window_bounds = array<i64: 1, 128>}, {transform_indices = @transform_3, window_bounds = array<i64: 1, 4, 4, 128>}]} {
    %cst = arith.constant 0.000000e+00 : f32
    %0 = vector.broadcast %cst : f32 to vector<10x10x3xf32>
    %c0 = arith.constant 0 : index
    %c0_0 = arith.constant 0 : index
    %c0_1 = arith.constant 0 : index
    %1 = vector.load %arg5[%c0, %c0_0, %c0_1] : memref<10x10x3xf32, #tpu.memory_space<vmem>>, vector<10x10x3xf32>
    tpu.vector_store %arg5[%c0, %c0_0, %c0_1], %0 {strides = array<i32>} : memref<10x10x3xf32, #tpu.memory_space<vmem>>, vector<10x10x3xf32>,
    %c0_2 = arith.constant 0 : index
    %c0_3 = arith.constant 0 : index
    %c0_4 = arith.constant 0 : index
    %c0_5 = arith.constant 0 : index
    %2 = vector.load %arg1[%c0_2, %c0_3, %c0_4, %c0_5] : memref<1x8x8x3xbf16, #tpu.memory_space<vmem>>, vector<1x8x8x3xbf16>
    %3 = vector.shape_cast %2 : vector<1x8x8x3xbf16> to vector<8x8x3xbf16>
    %4 = arith.extf %3 : vector<8x8x3xbf16> to vector<8x8x3xf32>
    %c1 = arith.constant 1 : index
    %c1_6 = arith.constant 1 : index
    %c0_7 = arith.constant 0 : index
    %5 = vector.load %arg5[%c1, %c1_6, %c0_7] : memref<10x10x3xf32, #tpu.memory_space<vmem>>, vector<8x8x3xf32>
    tpu.vector_store %arg5[%c1, %c1_6, %c0_7], %4 {strides = array<i32>} : memref<10x10x3xf32, #tpu.memory_space<vmem>>, vector<8x8x3xf32>,
    %c0_8 = arith.constant 0 : index
    %c0_9 = arith.constant 0 : index
    %c0_10 = arith.constant 0 : index
    %6 = vector.load %arg5[%c0_8, %c0_9, %c0_10] : memref<10x10x3xf32, #tpu.memory_space<vmem>>, vector<8x8x3xf32>
    %c0_11 = arith.constant 0 : index
    %c1_12 = arith.constant 1 : index
    %c0_13 = arith.constant 0 : index
    %7 = vector.load %arg5[%c0_11, %c1_12, %c0_13] : memref<10x10x3xf32, #tpu.memory_space<vmem>>, vector<8x8x3xf32>
    %c0_14 = arith.constant 0 : index
    %c2 = arith.constant 2 : index
    %c0_15 = arith.constant 0 : index
    %8 = vector.load %arg5[%c0_14, %c2, %c0_15] : memref<10x10x3xf32, #tpu.memory_space<vmem>>, vector<8x8x3xf32>
    %c1_16 = arith.constant 1 : index
    %c0_17 = arith.constant 0 : index
    %c0_18 = arith.constant 0 : index
    %9 = vector.load %arg5[%c1_16, %c0_17, %c0_18] : memref<10x10x3xf32, #tpu.memory_space<vmem>>, vector<8x8x3xf32>
    %c1_19 = arith.constant 1 : index
    %c1_20 = arith.constant 1 : index
    %c0_21 = arith.constant 0 : index
    %10 = vector.load %arg5[%c1_19, %c1_20, %c0_21] : memref<10x10x3xf32, #tpu.memory_space<vmem>>, vector<8x8x3xf32>
    %c1_22 = arith.constant 1 : index
    %c2_23 = arith.constant 2 : index
    %c0_24 = arith.constant 0 : index
    %11 = vector.load %arg5[%c1_22, %c2_23, %c0_24] : memref<10x10x3xf32, #tpu.memory_space<vmem>>, vector<8x8x3xf32>
    %c2_25 = arith.constant 2 : index
    %c0_26 = arith.constant 0 : index
    %c0_27 = arith.constant 0 : index
    %12 = vector.load %arg5[%c2_25, %c0_26, %c0_27] : memref<10x10x3xf32, #tpu.memory_space<vmem>>, vector<8x8x3xf32>
    %c2_28 = arith.constant 2 : index
    %c1_29 = arith.constant 1 : index
    %c0_30 = arith.constant 0 : index
    %13 = vector.load %arg5[%c2_28, %c1_29, %c0_30] : memref<10x10x3xf32, #tpu.memory_space<vmem>>, vector<8x8x3xf32>
    %c2_31 = arith.constant 2 : index
    %c2_32 = arith.constant 2 : index
    %c0_33 = arith.constant 0 : index
    %14 = vector.load %arg5[%c2_31, %c2_32, %c0_33] : memref<10x10x3xf32, #tpu.memory_space<vmem>>, vector<8x8x3xf32>
    %15 = tpu.concatenate %6, %7, %8, %9, %10, %11, %12, %13, %14 in 2 : vector<8x8x3xf32>, vector<8x8x3xf32>, vector<8x8x3xf32>, vector<8x8x3xf32>, vector<8x8x3xf32>, vector<8x8x3xf32>, vector<8x8x3xf32>, vector<8x8x3xf32>, vector<8x8x3xf32> -> vector<8x8x27xf32>
    %16 = vector.shape_cast %15 : vector<8x8x27xf32> to vector<64x27xf32>
    %17 = arith.truncf %16 : vector<64x27xf32> to vector<64x27xbf16>
    %c0_34 = arith.constant 0 : index
    %c0_35 = arith.constant 0 : index
    %18 = vector.load %arg2[%c0_34, %c0_35] : memref<27x128xbf16, #tpu.memory_space<vmem>>, vector<27x128xbf16>
    %cst_36 = arith.constant dense<0.000000e+00> : vector<64x128xf32>
    %19 = tpu.matmul %17, %18, %cst_36 {dimension_numbers = #tpu.dot_dimension_numbers<[1], [0], [0], [1], [0, 0, 1, 1], [], []>} : vector<64x27xbf16>, vector<27x128xbf16>, vector<64x128xf32> -> vector<64x128xf32>
    %c0_37 = arith.constant 0 : index
    %c0_38 = arith.constant 0 : index
    %20 = vector.load %arg3[%c0_37, %c0_38] : memref<1x128xf32, #tpu.memory_space<vmem>>, vector<1x128xf32>
    %21 = vector.broadcast %20 : vector<1x128xf32> to vector<64x128xf32>
    %22 = arith.addf %19, %21 : vector<64x128xf32>
    %cst_39 = arith.constant 0.000000e+00 : f32
    %23 = vector.broadcast %cst_39 : f32 to vector<64x128xf32>
    %24 = arith.maximumf %22, %23 : vector<64x128xf32>
    %25 = vector.shape_cast %24 : vector<64x128xf32> to vector<8x4x2x128xf32>
    %cst_40 = arith.constant dense<0xFF800000> : vector<8x4x128xf32>
    %26 = vector.multi_reduction <maximumf>, %25, %cst_40 [2] : vector<8x4x2x128xf32> to vector<8x4x128xf32>
    %27 = vector.shape_cast %26 : vector<8x4x128xf32> to vector<4x2x4x128xf32>
    %cst_41 = arith.constant dense<0xFF800000> : vector<4x4x128xf32>
    %28 = vector.multi_reduction <maximumf>, %27, %cst_41 [1] : vector<4x2x4x128xf32> to vector<4x4x128xf32>
    %29 = arith.truncf %28 : vector<4x4x128xf32> to vector<4x4x128xbf16>
    %c0_42 = arith.constant 0 : index
    %c0_43 = arith.constant 0 : index
    %c0_44 = arith.constant 0 : index
    %c0_45 = arith.constant 0 : index
    %30 = vector.load %arg4[%c0_42, %c0_43, %c0_44, %c0_45] : memref<1x4x4x128xbf16, #tpu.memory_space<vmem>>, vector<1x4x4x128xbf16>
    %31 = vector.shape_cast %30 : vector<1x4x4x128xbf16> to vector<4x4x128xbf16>
    %32 = vector.shape_cast %29 : vector<4x4x128xbf16> to vector<1x4x4x128xbf16>
    tpu.vector_store %arg4[%c0_42, %c0_43, %c0_44, %c0_45], %32 {strides = array<i32>} : memref<1x4x4x128xbf16, #tpu.memory_space<vmem>>, vector<1x4x4x128xbf16>,
    return
  }
  func.func @transform_0(%arg0: i32) -> (i32, i32, i32, i32) {
    %c0_i32 = arith.constant 0 : i32
    %c0_i32_0 = arith.constant 0 : i32
    %c0_i32_1 = arith.constant 0 : i32
    %c0_i32_2 = arith.constant 0 : i32
    return %arg0, %c0_i32, %c0_i32_0, %c0_i32_1 : i32, i32, i32, i32
  }
  func.func @transform_1(%arg0: i32) -> (i32, i32) {
    %c0_i32 = arith.constant 0 : i32
    %c0_i32_0 = arith.constant 0 : i32
    %c0_i32_1 = arith.constant 0 : i32
    return %c0_i32, %c0_i32_0 : i32, i32
  }
  func.func @transform_2(%arg0: i32) -> (i32, i32) {
    %c0_i32 = arith.constant 0 : i32
    %c0_i32_0 = arith.constant 0 : i32
    %c0_i32_1 = arith.constant 0 : i32
    return %c0_i32, %c0_i32_0 : i32, i32
  }
  func.func @transform_3(%arg0: i32) -> (i32, i32, i32, i32) {
    %c0_i32 = arith.constant 0 : i32
    %c0_i32_0 = arith.constant 0 : i32
    %c0_i32_1 = arith.constant 0 : i32
    %c0_i32_2 = arith.constant 0 : i32
    return %arg0, %c0_i32, %c0_i32_0, %c0_i32_1 : i32, i32, i32, i32
  }
}

</mosaic_0001>

<bundles_post_ra>
// kernel: tpu_custom_call.1
= control target key start
LH: loop header
LB: loop body
LE: loop exit
PB: predicated region body
PF: predicated region fallthrough
CT: control target
= control target key end

     0   :  { %8 = vsyncpa [#allocation4], 0  ;;  %s2467_s0 = inlined_call_operand.vmem [shape: bf16[2,8,8,3], index: 0, kind: input, shape index: {}]   ;;  %s2468_s1 = inlined_call_operand.vmem [shape: bf16[27,128], index: 1, kind: input, shape index: {}]   ;;  %s2469_s2 = inlined_call_operand.vmem [shape: f32[1,128], index: 2, kind: input, shape index: {}]   ;;  %s2470_s3 = inlined_call_operand.hbm [shape: bf16[2,4,4,128], index: 3, kind: output, shape index: {}]  }
   0x1   :  { %10 = vsyncpa [#allocation4 + $0x1], 0  ;;  %s1946_s12 = smov 0   ;;  %s1948_s13 = smov 0  }
   0x2   :  { %s1950_s14 = smov 0   ;;  %s1952_s15 = smov 0  }
   0x3 LB: > { %s1967_s16 = sadd.s32 4294967295, %s1910_s15   ;;  %s1568_s17 = sadd.s32 4294967294, %s1910_s15   ;;  %s1910_s15 = sphi %s1952_s15, %s2476_s15   ;;  %s1906_s14 = sphi %s1950_s14, %s2475_s14   ;;  %s1902_s13 = sphi %s1948_s13, %s2474_s13   ;;  %s1898_s12 = sphi %s1946_s12, %s2473_s12  }
   0x4   : > { %s1971_s18 = sadd.s32 1, %s1910_s15   ;;  %s91_s19 = sadd.s32 1, %s1906_s14 }
   0x5   : > { %s88_s20 = ssub.s32 %s1910_s15, %s1971_s18  ;;  %p101_p0 = scmp.ne.s32.totalorder %s1906_s14, %s1902_s13 }
   0x6   : > { %p89_p1 = scmp.eq.s32.totalorder %s88_s20, 0  ;;  %p102_p2 = scmp.eq.s32.totalorder %s1967_s16, 1 }
   0x7   : > { %p107_p3 = scmp.ne.s32.totalorder %s1902_s13, %s1898_s12  ;;  %p108_p4 = scmp.eq.s32.totalorder %s1568_s17, 1 }
   0x8   : > { %s1982_s21 = scalar_select %p89_p1, %s1906_s14, %s91_s19  }
   0x9   : > { %p1984_p5 = por %p102_p2, %p101_p0  ;;  %p1988_p6 = por %p108_p4, %p107_p3 }
   0xa   : > { %p1571_p7 = scmp.ge.s32.totalorder %s1910_s15, 1  ;;  %p140_p8 = scmp.lt.s32.totalorder %s1910_s15, 3 }
   0xc   : > { %p141_p9 = pnand %p1571_p7, %p140_p8 }
   0xd   : > { %p164_p10 = scmp.lt.s32.totalorder (!%p141_p9), %s1967_s16, 1  ;;  %vm170_vm0 = vcmask (!%p141_p9), 23552   ;;  %vm172_vm1 = vcmask (!%p141_p9), 17408   ;;  %v1912_v0 = vmov (!%p141_p9), 0.0   ;;  %s1913_s29 = smov (!%p141_p9), 3   ;;  %vm656_vm2 = vcmask (!%p141_p9), 1044480  }
   0xe   : > { %144 = sbr.rel (%p141_p9) target bundleno = 552 (0x228), region = 32  ;;  %176 = vst.msk [vmem:[#allocation2 + $0x20] sm:$0xff] (!%p141_p9), %vm170_vm0, %v1912_v0  ;;  %178 = vst.msk [vmem:[#allocation2 + $0x30] sm:$0xff] (!%p141_p9), %vm170_vm0, %v1912_v0  ;;  %s1914_s30 = smov (!%p141_p9), 6   ;;  %vm657_vm3 = vcmask (!%p141_p9), 1045504   ;;  %vm554_vm4 = vcmask (!%p141_p9), 48128  }
   0xf   : > { %177 = vst.msk [vmem:[#allocation2 + $0x28] sm:$0x3] (!%p141_p9), %vm172_vm1, %v1912_v0  ;;  %179 = vst.msk [vmem:[#allocation2 + $0x38] sm:$0x3] (!%p141_p9), %vm172_vm1, %v1912_v0  ;;  %s1915_s4 = smov (!%p141_p9), 9   ;;  %s1916_s5 = smov (!%p141_p9), 12  }
  0x10   : > { %171 = vst.msk [vmem:[#allocation2] sm:$0xff] (!%p141_p9), %vm170_vm0, %v1912_v0  ;;  %174 = vst.msk [vmem:[#allocation2 + $0x10] sm:$0xff] (!%p141_p9), %vm170_vm0, %v1912_v0  ;;  %s1917_s6 = smov (!%p141_p9), 15   ;;  %s1918_s7 = smov (!%p141_p9), 18   ;;  %vm563_vm5 = vcmask (!%p141_p9), 72704   ;;  %vm572_vm6 = vcmask (!%p141_p9), 97280  }
  0x11   : > { %173 = vst.msk [vmem:[#allocation2 + $0x8] sm:$0x3] (!%p141_p9), %vm172_vm1, %v1912_v0  ;;  %175 = vst.msk [vmem:[#allocation2 + $0x18] sm:$0x3] (!%p141_p9), %vm172_vm1, %v1912_v0  ;;  %s1920_s17 = smov (!%p141_p9), 21   ;;  %s1921_s19 = smov (!%p141_p9), 24  }
  0x12   : > { %180 = vst.msk [vmem:[#allocation2 + $0x40] sm:$0xff] (!%p141_p9), %vm170_vm0, %v1912_v0  ;;  %182 = vst.msk [vmem:[#allocation2 + $0x50] sm:$0xff] (!%p141_p9), %vm170_vm0, %v1912_v0  ;;  %vm581_vm7 = vcmask (!%p141_p9), 121856   ;;  %vm590_vm8 = vcmask (!%p141_p9), 146432   ;;  %vm599_vm9 = vcmask (!%p141_p9), 171008   ;;  %vm608_vm10 = vcmask (!%p141_p9), 195584  }
  0x13   : > { %181 = vst.msk [vmem:[#allocation2 + $0x48] sm:$0x3] (!%p141_p9), %vm172_vm1, %v1912_v0  ;;  %183 = vst.msk [vmem:[#allocation2 + $0x58] sm:$0x3] (!%p141_p9), %vm172_vm1, %v1912_v0  ;;  %vm643_vm11 = vcmask (!%p141_p9), 220160   ;;  %vm912_vm12 = vcmask (!%p141_p9), 1041408  }
  0x14   : > { %184 = vst.msk [vmem:[#allocation2 + $0x60] sm:$0xff] (!%p141_p9), %vm170_vm0, %v1912_v0  ;;  %186 = vst.msk [vmem:[#allocation2 + $0x70] sm:$0xff] (!%p141_p9), %vm170_vm0, %v1912_v0  ;;  %vm1426_vm13 = vcmask (!%p141_p9), 1041409   ;;  %vm1429_vm14 = vcmask (!%p141_p9), 1042434   ;;  %vm1432_vm15 = vcmask (!%p141_p9), 1043459  }
  0x15   : > { %185 = vst.msk [vmem:[#allocation2 + $0x68] sm:$0x3] %vm172_vm1, %v1912_v0  ;;  %187 = vst.msk [vmem:[#allocation2 + $0x78] sm:$0x3] %vm172_vm1, %v1912_v0  ;;  %s165_s24 = scalar_select %p164_p10, %s1967_s16, 1 }
  0x16   : > { %188 = vst.msk [vmem:[#allocation2 + $0x80] sm:$0xff] %vm170_vm0, %v1912_v0  ;;  %190 = vst.msk [vmem:[#allocation2 + $0x90] sm:$0xff] %vm170_vm0, %v1912_v0 }
  0x17   : > { %189 = vst.msk [vmem:[#allocation2 + $0x88] sm:$0x3] %vm172_vm1, %v1912_v0  ;;  %191 = vst.msk [vmem:[#allocation2 + $0x98] sm:$0x3] %vm172_vm1, %v1912_v0  ;;  %s1591_s25 = sshll.u32 %s165_s24, 5  ;;  %v1846_v0 = vld [vmem:[%s2468_s1] sm:$0xff]  }
  0x18   : > { %s168_s28 = scalar_lea.vmem %s2467_s0, %s1591_s25  ;;  %v225_v13 = vld [vmem:[#allocation2 + $0x1] sm:$0xff]  ;;  %1618 = vmatprep.subr.bf16.mxu0 %v1846_v0  ;;  %1630 = vmatprep.subr.bf16.mxu1 %v1846_v0  ;;  %s161_s25 = sand.u32 1, %s1902_s13  }
  0x19   : > { %v1594_v1 = vld [vmem:[%s168_s28] sm:$0xff]   ;;  %v1609_v2 = vld [vmem:[%s168_s28 + $0x8] sm:$0xff]   ;;  %v1610_v3 = vld [vmem:[%s168_s28 + $0x10] sm:$0xff]   ;;  %1619 = vmatpush3.bf16.msra.mxu0 %v1846_v0  ;;  %1632 = vmatpush3.bf16.msra.mxu1 %v1846_v0  ;;  %s1572_s26 = sshll.u32 %s161_s25, 3 }
  0x1a   : > { %v1596_v4 = vunpack.c.h.bf16 %v1594_v1  ;;  %v1599_v5 = vunpack.c.l.bf16 %v1609_v2  ;;  %v1600_v6 = vunpack.c.h.bf16 %v1609_v2  ;;  %v1595_v7 = vunpack.c.l.bf16 %v1594_v1  ;;  %v1611_v8 = vld [vmem:[%s168_s28 + $0x18] sm:$0xff]   ;;  %v233_v25 = vld [vmem:[#allocation2 + $0x2] sm:$0xff]  ;;  %s2374_s27 = scalar_lea.vmem [#allocation3], %s1572_s26  ;;  %s1592_s28 = sshll.u32 %s1967_s16, 7 }
  0x1b   : > { %v1604_v9 = vunpack.c.h.bf16 %v1610_v3  ;;  %v1607_v10 = vunpack.c.l.bf16 %v1611_v8  ;;  %v1603_v11 = vunpack.c.l.bf16 %v1610_v3  ;;  %v1608_v12 = vunpack.c.h.bf16 %v1611_v8  ;;  %v1847_v1 = vld [vmem:[%s2468_s1 + $0x8] sm:$0x3f]   ;;  %s2426_s16 = scalar_lea.sflag [#allocation4], %s161_s25 }
  0x1c   : > { %210 = vst.msk [vmem:[#allocation2 + $0x21] sm:$0xff] %vm170_vm0, %v1596_v4  ;;  %211 = vst.msk [vmem:[#allocation2 + $0x31] sm:$0xff] %vm170_vm0, %v1599_v5  ;;  %v1919_v2 = vmov 65535  }
  0x1d   : > { %209 = vst.msk [vmem:[#allocation2 + $0x11] sm:$0xff] %vm170_vm0, %v1595_v7  ;;  %212 = vst.msk [vmem:[#allocation2 + $0x41] sm:$0xff] %vm170_vm0, %v1600_v6  ;;  %v273_v61 = vld [vmem:[#allocation2 + $0x90] sm:$0xff]  ;;  %v658_v3 = vsel %vm656_vm2, 4294967295, %v1919_v2 }
  0x1e   : > { %214 = vst.msk [vmem:[#allocation2 + $0x61] sm:$0xff] %vm170_vm0, %v1604_v9  ;;  %215 = vst.msk [vmem:[#allocation2 + $0x71] sm:$0xff] %vm170_vm0, %v1607_v10  ;;  %v281_v4 = vld [vmem:[#allocation2 + $0x91] sm:$0xff]  ;;  %v659_v5 = vsel %vm657_vm3, %v658_v3, 0 }
  0x1f   : > { %213 = vst.msk [vmem:[#allocation2 + $0x51] sm:$0xff] %vm170_vm0, %v1603_v11  ;;  %216 = vst.msk [vmem:[#allocation2 + $0x81] sm:$0xff] %vm170_vm0, %v1608_v12  ;;  %v661_v6 = vand.u32 %v1847_v1, %v659_v5  ;;  %v289_v8 = vld [vmem:[#allocation2 + $0x92] sm:$0xff] }
  0x21   : > { %1620 = vmatprep.subr.bf16.mxu0 %v661_v6  ;;  %1631 = vmatprep.subr.bf16.mxu1 %v661_v6 }
  0x22   : > { %1621 = vmatpush3.bf16.msra.mxu0 %v661_v6  ;;  %1633 = vmatpush3.bf16.msra.mxu1 %v661_v6 }
  0x23   : > { %v227_v14 = vld [vmem:[#allocation2 + $0x21] sm:$0xff]  ;;  %v228_v15 = vld [vmem:[#allocation2 + $0x31] sm:$0xff] }
  0x24   : > { %v226_v16 = vld [vmem:[#allocation2 + $0x11] sm:$0xff]  ;;  %v2029_v17 = vpack.i.bf16 %v228_v15, %v227_v14  ;;  %v229_v21 = vld [vmem:[#allocation2 + $0x41] sm:$0xff] }
  0x25   : > { %v1686_v18 = vpack.i.bf16 %v226_v16, %v225_v13  ;;  %v231_v19 = vld [vmem:[#allocation2 + $0x61] sm:$0xff]  ;;  %v232_v20 = vld [vmem:[#allocation2 + $0x71] sm:$0xff]  ;;  %v1746_v50 = vpack.i.bf16 %v227_v14, %v226_v16  ;;  %v1756_v53 = vpack.i.bf16 %v229_v21, %v228_v15 }
  0x26   : > { %v230_v22 = vld [vmem:[#allocation2 + $0x51] sm:$0xff]  ;;  %1697 = vrot.lane.b32.xlu1 %v2029_v17, %s1913_s29  ;;  %v2032_v23 = vpack.i.bf16 %v232_v20, %v231_v19  ;;  %v237_v26 = vld [vmem:[#allocation2 + $0x42] sm:$0xff] }
  0x27   : > { %1687 = vrot.lane.b32.xlu0 %v1686_v18, %s1913_s29  ;;  %v2034_v24 = vpack.i.bf16 %v230_v22, %v229_v21  ;;  %v238_v27 = vld [vmem:[#allocation2 + $0x52] sm:$0xff]  ;;  %v239_v31 = vld [vmem:[#allocation2 + $0x62] sm:$0xff]  ;;  %v1751_v49 = vpack.i.bf16 %v231_v19, %v230_v22 }
  0x28   : > { %v234_v28 = vld [vmem:[#allocation2 + $0x12] sm:$0xff]  ;;  %v2038_v29 = vpack.i.bf16 %v238_v27, %v237_v26  ;;  %v235_v33 = vld [vmem:[#allocation2 + $0x22] sm:$0xff]  ;;  %v1771_v54 = vpack.i.bf16 %v239_v31, %v238_v27 }
  0x29   : > { %v1706_v30 = vpack.i.bf16 %v234_v28, %v233_v25  ;;  %v240_v32 = vld [vmem:[#allocation2 + $0x72] sm:$0xff]  ;;  %v2047_v38 = vld [vmem:[#allocation2 + $0x60] sm:$0xff]  ;;  %v1766_v55 = vpack.i.bf16 %v235_v33, %v234_v28 }
  0x2a   : > { %1702 = vrot.lane.b32.xlu1 %v2032_v23, %s1913_s29  ;;  %v236_v34 = vld [vmem:[#allocation2 + $0x32] sm:$0xff]  ;;  %v2041_v35 = vpack.i.bf16 %v240_v32, %v239_v31  ;;  %v2051_v40 = vld [vmem:[#allocation2 + $0x20] sm:$0xff] }
  0x2b   : > { %1692 = vrot.lane.b32.xlu0 %v2034_v24, %s1913_s29  ;;  %v2043_v36 = vpack.i.bf16 %v236_v34, %v235_v33  ;;  %v2045_v37 = vld [vmem:[#allocation2 + $0x50] sm:$0xff]  ;;  %v248_v44 = vld [vmem:[#allocation2 + $0x80] sm:$0xff]  ;;  %v1776_v58 = vpack.i.bf16 %v237_v26, %v236_v34  ;;  %s1506_s29 = sshll.u32 %s2374_s27, 4  ;;  %s2421_s29 = int_to_ptr.vmem [resolvable:$true] %s1506_s29 }
  0x2c   : > { %v2049_v39 = vld [vmem:[#allocation2 + $0x10] sm:$0xff]  ;;  %v1731_v41 = vpack.i.bf16 %v2047_v38, %v2045_v37  ;;  %v2063_v46 = vld [vmem:[#allocation2 + $0x40] sm:$0xff]  ;;  %v1801_v62 = vpack.i.bf16 %v273_v61, %v248_v44 }
  0x2d   : > { %v1726_v42 = vpack.i.bf16 %v2051_v40, %v2049_v39  ;;  %v2059_v43 = vld [vmem:[#allocation2 + $0x70] sm:$0xff]  ;;  %v256_v51 = vld [vmem:[#allocation2 + $0x81] sm:$0xff]  ;;  %v1796_v63 = vpack.i.bf16 %v2045_v37, %v2063_v46 }
  0x2e   : > { %1712 = vrot.lane.b32.xlu1 %v2038_v29, %s1914_s30  ;;  %v2061_v45 = vld [vmem:[#allocation2 + $0x30] sm:$0xff]  ;;  %v1741_v47 = vpack.i.bf16 %v248_v44, %v2059_v43  ;;  %v1761_v52 = vpack.i.bf16 %v256_v51, %v232_v20  ;;  %v264_v56 = vld [vmem:[#allocation2 + $0x82] sm:$0xff]  ;;  %v1791_v59 = vpack.i.bf16 %v2059_v43, %v2047_v38  ;;  %v1821_v7 = vpack.i.bf16 %v281_v4, %v256_v51 }
  0x2f   : > { %1707 = vrot.lane.b32.xlu0 %v1706_v30, %s1914_s30  ;;  %v1736_v48 = vpack.i.bf16 %v2063_v46, %v2061_v45  ;;  %v1781_v57 = vpack.i.bf16 %v264_v56, %v240_v32  ;;  %v1786_v60 = vpack.i.bf16 %v2061_v45, %v2051_v40  ;;  %v1841_v9 = vpack.i.bf16 %v289_v8, %v264_v56 }
  0x32   : > { %1722 = vrot.lane.b32.xlu1 %v2041_v35, %s1914_s30 }
  0x33   : > { %1717 = vrot.lane.b32.xlu0 %v2043_v36, %s1914_s30 }
  0x36   : > { %1732 = vrot.lane.b32.xlu1 %v1731_v41, %s1915_s4 }
  0x37   : > { %1727 = vrot.lane.b32.xlu0 %v1726_v42, %s1915_s4 }
  0x3a   : > { %1742 = vrot.lane.b32.xlu1 %v1741_v47, %s1915_s4 }
  0x3b   : > { %1737 = vrot.lane.b32.xlu0 %v1736_v48, %s1915_s4 }
  0x3e   : > { %1752 = vrot.lane.b32.xlu1 %v1751_v49, %s1916_s5 }
  0x3f   : > { %1747 = vrot.lane.b32.xlu0 %v1746_v50, %s1916_s5 }
  0x42   : > { %1762 = vrot.lane.b32.xlu1 %v1761_v52, %s1916_s5 }
  0x43   : > { %1757 = vrot.lane.b32.xlu0 %v1756_v53, %s1916_s5  ;;  %s2419_s5 = scalar_lea.hbm %s2470_s3, %s1592_s28 }
  0x46   : > { %1772 = vrot.lane.b32.xlu1 %v1771_v54, %s1917_s6 }
  0x47   : > { %1767 = vrot.lane.b32.xlu0 %v1766_v55, %s1917_s6 }
  0x4a   : > { %1782 = vrot.lane.b32.xlu1 %v1781_v57, %s1917_s6 }
  0x4b   : > { %1777 = vrot.lane.b32.xlu0 %v1776_v58, %s1917_s6  ;;  %s1848_s6 = scalar_lea.vmem %s2421_s29, 128 }
  0x4c   : > { %p1849_p11 = scmp.ne.s32.totalorder %s2421_s29, %s1848_s6 }
  0x4e   : > { %1792 = vrot.lane.b32.xlu1 %v1791_v59, %s1918_s7  ;;  %p1850_p12 = pnand %p1849_p11, %p1984_p5 }
  0x4f   : > { %1787 = vrot.lane.b32.xlu0 %v1786_v60, %s1918_s7 }
  0x50   : > { %p1851_p13 = pneg %p1850_p12 }
  0x52   : > { %1802 = vrot.lane.b32.xlu1 %v1801_v62, %s1918_s7 }
  0x53   : > { %1797 = vrot.lane.b32.xlu0 %v1796_v63, %s1918_s7  ;;  %s1923_s7 = smov [#allocation3]  }
  0x54   : > { %s1852_s8 = sshll.u32 %s1923_s7, 4  ;;  %s1853_s8 = int_to_ptr.vmem [resolvable:$false] %s1852_s8 }
  0x55   : > { %s1854_s9 = scalar_lea.vmem %s1853_s8, 256  ;;  %p1855_p0 = scmp.lt.s32.totalorder %s2421_s29, %s1853_s8 }
  0x56   : > { %1812 = vrot.lane.b32.xlu1 %v2032_v23, %s1920_s17  ;;  %p1856_p1 = scmp.lt.s32.totalorder %s1854_s9, %s1848_s6 }
  0x57   : > { %1807 = vrot.lane.b32.xlu0 %v2029_v17, %s1920_s17 }
  0x58   : > { %p1857_p2 = por %p1856_p1, %p1855_p0 }
  0x5a   : > { %1822 = vrot.lane.b32.xlu1 %v1821_v7, %s1920_s17  ;;  %p1858_p3 = pnand %p1857_p2, %p1851_p13 }
  0x5b   : > { %1817 = vrot.lane.b32.xlu0 %v2034_v24, %s1920_s17 }
  0x5e   : > { %1832 = vrot.lane.b32.xlu1 %v2041_v35, %s1921_s19 }
  0x5f   : > { %1827 = vrot.lane.b32.xlu0 %v2043_v36, %s1921_s19 }
  0x62   : > { %1842 = vrot.lane.b32.xlu1 %v1841_v9, %s1921_s19 }
  0x63   : > { %1837 = vrot.lane.b32.xlu0 %v2038_v29, %s1921_s19  ;;  %v217_v29 = vld [vmem:[#allocation2] sm:$0xff] }
  0x98   : > { %v1698_v10 = vpop.permute.xlu1 %1697 }
  0x99   : > { %v1688_v11 = vpop.permute.xlu0 %1687  ;;  %v1700_v24 = vunpack.i.h.bf16 %v1698_v10  ;;  %v1699_v25 = vunpack.i.l.bf16 %v1698_v10 }
  0x9a   : > { %v1689_v28 = vunpack.i.l.bf16 %v1688_v11  ;;  %v1690_v30 = vunpack.i.h.bf16 %v1688_v11 }
  0x9b   : > { %v549_v31 = vsel %vm170_vm0, %v2061_v45, %v1700_v24  ;;  %v548_v32 = vsel %vm170_vm0, %v2051_v40, %v1699_v25 }
  0x9c   : > { %v1703_v12 = vpop.permute.xlu1 %1702  ;;  %v546_v47 = vsel %vm170_vm0, %v217_v29, %v1689_v28  ;;  %v547_v45 = vsel %vm170_vm0, %v2049_v39, %v1690_v30 }
  0x9d   : > { %v1693_v13 = vpop.permute.xlu0 %1692  ;;  %v1705_v36 = vunpack.i.h.bf16 %v1703_v12  ;;  %v1704_v41 = vunpack.i.l.bf16 %v1703_v12 }
  0x9e   : > { %v1694_v33 = vunpack.i.l.bf16 %v1693_v13  ;;  %v1695_v42 = vunpack.i.h.bf16 %v1693_v13 }
  0x9f   : > { %v553_v59 = vsel %vm170_vm0, %v2059_v43, %v1705_v36  ;;  %v552_v60 = vsel %vm170_vm0, %v2047_v38, %v1704_v41 }
  0xa0   : > { %v1713_v14 = vpop.permute.xlu1 %1712  ;;  %v550_v53 = vsel %vm170_vm0, %v2063_v46, %v1694_v33  ;;  %v551_v39 = vsel %vm170_vm0, %v2045_v37, %v1695_v42 }
  0xa1   : > { %v1708_v15 = vpop.permute.xlu0 %1707  ;;  %v1714_v44 = vunpack.i.l.bf16 %v1713_v14  ;;  %v1715_v48 = vunpack.i.h.bf16 %v1713_v14 }
  0xa2   : > { %v1710_v49 = vunpack.i.h.bf16 %v1708_v15  ;;  %v1709_v50 = vunpack.i.l.bf16 %v1708_v15 }
  0xa3   : > { %v559_v61 = vsel %vm554_vm4, %v550_v53, %v1714_v44  ;;  %v560_v46 = vsel %vm554_vm4, %v551_v39, %v1715_v48 }
  0xa4   : > { %v1723_v16 = vpop.permute.xlu1 %1722  ;;  %v555_v62 = vsel %vm554_vm4, %v546_v47, %v1709_v50  ;;  %v556_v63 = vsel %vm554_vm4, %v547_v45, %v1710_v49 }
  0xa5   : > { %v1718_v17 = vpop.permute.xlu0 %1717  ;;  %v1725_v40 = vunpack.i.h.bf16 %v1723_v16  ;;  %v1724_v51 = vunpack.i.l.bf16 %v1723_v16 }
  0xa6   : > { %v1720_v52 = vunpack.i.h.bf16 %v1718_v17  ;;  %v1719_v54 = vunpack.i.l.bf16 %v1718_v17 }
  0xa7   : > { %v561_v1 = vsel %vm554_vm4, %v552_v60, %v1724_v51  ;;  %v562_v43 = vsel %vm554_vm4, %v553_v59, %v1725_v40 }
  0xa8   : > { %v1733_v18 = vpop.permute.xlu1 %1732  ;;  %v558_v38 = vsel %vm554_vm4, %v549_v31, %v1720_v52  ;;  %v557_v37 = vsel %vm554_vm4, %v548_v32, %v1719_v54 }
  0xa9   : > { %v2086_v19 = vpop.permute.xlu0 %1727  ;;  %v1735_v55 = vunpack.i.h.bf16 %v1733_v18  ;;  %v1734_v56 = vunpack.i.l.bf16 %v1733_v18 }
  0xaa   : > { %v1729_v0 = vunpack.i.l.bf16 %v2086_v19  ;;  %v1730_v2 = vunpack.i.h.bf16 %v2086_v19 }
  0xab   : > { %v568_v3 = vsel %vm563_vm5, %v559_v61, %v1734_v56  ;;  %v569_v4 = vsel %vm563_vm5, %v560_v46, %v1735_v55 }
  0xac   : > { %v2088_v20 = vpop.permute.xlu1 %1742  ;;  %v564_v12 = vsel %vm563_vm5, %v555_v62, %v1729_v0  ;;  %v565_v16 = vsel %vm563_vm5, %v556_v63, %v1730_v2 }
  0xad   : > { %v2090_v21 = vpop.permute.xlu0 %1737  ;;  %v1744_v5 = vunpack.i.l.bf16 %v2088_v20  ;;  %v1745_v8 = vunpack.i.h.bf16 %v2088_v20 }
  0xae   : > { %v1740_v9 = vunpack.i.h.bf16 %v2090_v21  ;;  %v1739_v10 = vunpack.i.l.bf16 %v2090_v21 }
  0xaf   : > { %v570_v20 = vsel %vm563_vm5, %v561_v1, %v1744_v5 }
  0xb0   : > { %v2092_v22 = vpop.permute.xlu1 %1752  ;;  %v566_v29 = vsel %vm563_vm5, %v557_v37, %v1739_v10  ;;  %v567_v30 = vsel %vm563_vm5, %v558_v38, %v1740_v9 }
  0xb1   : > { %v2094_v23 = vpop.permute.xlu0 %1747  ;;  %v1754_v11 = vunpack.i.l.bf16 %v2092_v22  ;;  %v1755_v13 = vunpack.i.h.bf16 %v2092_v22 }
  0xb2   : > { %v1750_v14 = vunpack.i.h.bf16 %v2094_v23  ;;  %v1749_v15 = vunpack.i.l.bf16 %v2094_v23  ;;  %v571_v23 = vsel %vm563_vm5, %v562_v43, %v1745_v8 }
  0xb3   : > { %v578_v31 = vsel %vm572_vm6, %v569_v4, %v1755_v13 }
  0xb4   : > { %v2096_v26 = vpop.permute.xlu1 %1762  ;;  %v574_v32 = vsel %vm572_vm6, %v565_v16, %v1750_v14 }
  0xb5   : > { %v2098_v27 = vpop.permute.xlu0 %1757  ;;  %v1765_v17 = vunpack.i.h.bf16 %v2096_v26  ;;  %v1764_v18 = vunpack.i.l.bf16 %v2096_v26  ;;  %v577_v26 = vsel %vm572_vm6, %v568_v3, %v1754_v11 }
  0xb6   : > { %v1759_v19 = vunpack.i.l.bf16 %v2098_v27  ;;  %v1760_v21 = vunpack.i.h.bf16 %v2098_v27  ;;  %v573_v27 = vsel %vm572_vm6, %v564_v12, %v1749_v15 }
  0xb7   : > { %v580_v36 = vsel %vm572_vm6, %v571_v23, %v1765_v17 }
  0xb8   : > { %v2104_v34 = vpop.permute.xlu1 %1772  ;;  %v575_v41 = vsel %vm572_vm6, %v566_v29, %v1759_v19  ;;  %v576_v44 = vsel %vm572_vm6, %v567_v30, %v1760_v21 }
  0xb9   : > { %v2106_v35 = vpop.permute.xlu0 %1767  ;;  %v1775_v24 = vunpack.i.h.bf16 %v2104_v34  ;;  %v1774_v22 = vunpack.i.l.bf16 %v2104_v34  ;;  %v579_v34 = vsel %vm572_vm6, %v570_v20, %v1764_v18 }
  0xba   : > { %v1769_v33 = vunpack.i.l.bf16 %v2106_v35  ;;  %v1770_v42 = vunpack.i.h.bf16 %v2106_v35 }
  0xbb   : > { %v586_v47 = vsel %vm581_vm7, %v577_v26, %v1774_v22  ;;  %v587_v48 = vsel %vm581_vm7, %v578_v31, %v1775_v24 }
  0xbc   : > { %v2113_v57 = vpop.permute.xlu1 %1782  ;;  %v582_v35 = vsel %vm581_vm7, %v573_v27, %v1769_v33  ;;  %v583_v59 = vsel %vm581_vm7, %v574_v32, %v1770_v42 }
  0xbd   : > { %v2115_v58 = vpop.permute.xlu0 %1777  ;;  %v1784_v49 = vunpack.i.l.bf16 %v2113_v57  ;;  %v1785_v40 = vunpack.i.h.bf16 %v2113_v57 }
  0xbe   : > { %v1780_v51 = vunpack.i.h.bf16 %v2115_v58  ;;  %v1779_v52 = vunpack.i.l.bf16 %v2115_v58 }
  0xbf   : > { %v588_v61 = vsel %vm581_vm7, %v579_v34, %v1784_v49  ;;  %v589_v1 = vsel %vm581_vm7, %v580_v36, %v1785_v40 }
  0xc0   : > { %v2136_v6 = vpop.permute.xlu1 %1792  ;;  %v584_v43 = vsel %vm581_vm7, %v575_v41, %v1779_v52  ;;  %v585_v38 = vsel %vm581_vm7, %v576_v44, %v1780_v51 }
  0xc1   : > { %v2138_v7 = vpop.permute.xlu0 %1787  ;;  %v1794_v53 = vunpack.i.l.bf16 %v2136_v6  ;;  %v1795_v54 = vunpack.i.h.bf16 %v2136_v6 }
  0xc2   : > { %v1790_v55 = vunpack.i.h.bf16 %v2138_v7  ;;  %v1789_v56 = vunpack.i.l.bf16 %v2138_v7 }
  0xc3   : > { %v595_v2 = vsel %vm590_vm8, %v586_v47, %v1794_v53  ;;  %v596_v37 = vsel %vm590_vm8, %v587_v48, %v1795_v54  ;;  %v1922_v53 = vmov 1983009808   ;;  %v748_v54 = vlaneseq }
  0xc4   : > { %v1803_v25 = vpop.permute.xlu1 %1802  ;;  %v591_v3 = vsel %vm590_vm8, %v582_v35, %v1789_v56  ;;  %v592_v4 = vsel %vm590_vm8, %v583_v59, %v1790_v55  ;;  %v746_v35 = vunpack.c.l.s4 %v1922_v53  ;;  %v1575_v59 = vld [vmem:[%s2469_s2] ss:$0 sm:$0xff] }
  0xc5   : > { %v2156_v28 = vpop.permute.xlu0 %1797  ;;  %v1805_v60 = vunpack.i.h.bf16 %v1803_v25  ;;  %v1804_v39 = vunpack.i.l.bf16 %v1803_v25  ;;  %v749_v56 = vshrl.u32 %v748_v54, 7 }
  0xc6   : > { %v1799_v57 = vunpack.i.l.bf16 %v2156_v28  ;;  %v1800_v8 = vunpack.i.h.bf16 %v2156_v28  ;;  %v747_v55 = vunpack.c.0.s8 %v746_v35 }
  0xc7   : > { %v597_v6 = vsel %vm590_vm8, %v588_v61, %v1804_v39  ;;  %v598_v7 = vsel %vm590_vm8, %v589_v1, %v1805_v60 }
  0xc8   : > { %v1813_v50 = vpop.permute.xlu1 %1812  ;;  %v593_v9 = vsel %vm590_vm8, %v584_v43, %v1799_v57  ;;  %v594_v30 = vsel %vm590_vm8, %v585_v38, %v1800_v8  ;;  %v2220_v61 = vsub.s32 %v747_v55, %v749_v56 }
  0xc9   : > { %v1808_v45 = vpop.permute.xlu0 %1807  ;;  %v1814_v58 = vunpack.i.l.bf16 %v1813_v50  ;;  %v1815_v5 = vunpack.i.h.bf16 %v1813_v50 }
  0xca   : > { %v1810_v46 = vunpack.i.h.bf16 %v1808_v45  ;;  %v1809_v62 = vunpack.i.l.bf16 %v1808_v45 }
  0xcb   : > { %v604_v15 = vsel %vm599_vm9, %v595_v2, %v1814_v58  ;;  %v605_v22 = vsel %vm599_vm9, %v596_v37, %v1815_v5 }
  0xcc   : > { %v1823_v63 = vpop.permute.xlu1 %1822  ;;  %v600_v13 = vsel %vm599_vm9, %v591_v3, %v1809_v62  ;;  %v601_v14 = vsel %vm599_vm9, %v592_v4, %v1810_v46 }
  0xcd   : > { %v1818_v0 = vpop.permute.xlu0 %1817  ;;  %v1824_v10 = vunpack.i.l.bf16 %v1823_v63  ;;  %v1825_v20 = vunpack.i.h.bf16 %v1823_v63 }
  0xce   : > { %v1820_v21 = vunpack.i.h.bf16 %v1818_v0  ;;  %v1819_v24 = vunpack.i.l.bf16 %v1818_v0 }
  0xcf   : > { %v606_v26 = vsel %vm599_vm9, %v597_v6, %v1824_v10  ;;  %v607_v44 = vsel %vm599_vm9, %v598_v7, %v1825_v20 }
  0xd0   : > { %v1833_v11 = vpop.permute.xlu1 %1832  ;;  %v602_v47 = vsel %vm599_vm9, %v593_v9, %v1819_v24  ;;  %v603_v48 = vsel %vm599_vm9, %v594_v30, %v1820_v21 }
  0xd1   : > { %v1828_v12 = vpop.permute.xlu0 %1827  ;;  %v1835_v16 = vunpack.i.h.bf16 %v1833_v11  ;;  %v1834_v17 = vunpack.i.l.bf16 %v1833_v11 }
  0xd2   : > { %v1830_v18 = vunpack.i.h.bf16 %v1828_v12  ;;  %v1829_v19 = vunpack.i.l.bf16 %v1828_v12 }
  0xd3   : > { %v613_v23 = vsel %vm608_vm10, %v604_v15, %v1834_v17  ;;  %v614_v29 = vsel %vm608_vm10, %v605_v22, %v1835_v16 }
  0xd4   : > { %v609_v25 = vsel %vm608_vm10, %v600_v13, %v1829_v19  ;;  %v610_v28 = vsel %vm608_vm10, %v601_v14, %v1830_v18  ;;  %v1843_v31 = vpop.permute.xlu1 %1842  ;;  %v619_v33 = vpack.c.bf16 %v614_v29, %v613_v23 }
  0xd5   : > { %v1838_v27 = vpop.permute.xlu0 %1837  ;;  %v617_v32 = vpack.c.bf16 %v610_v28, %v609_v25  ;;  %v1845_v34 = vunpack.i.h.bf16 %v1843_v31  ;;  %v1844_v36 = vunpack.i.l.bf16 %v1843_v31 }
  0xd6   : > { %v1840_v41 = vunpack.i.h.bf16 %v1838_v27  ;;  %v1839_v42 = vunpack.i.l.bf16 %v1838_v27  ;;  %1626 = vmatprep.mubr.msk.bf16.mxu1 %vm643_vm11, %v619_v33 }
  0xd7   : > { %1622 = vmatprep.mubr.msk.bf16.mxu0 %vm643_vm11, %v617_v32  ;;  %v615_v49 = vsel %vm608_vm10, %v606_v26, %v1844_v36  ;;  %v616_v50 = vsel %vm608_vm10, %v607_v44, %v1845_v34 }
  0xd8   : > { %v611_v45 = vsel %vm608_vm10, %v602_v47, %v1839_v42  ;;  %v612_v40 = vsel %vm608_vm10, %v603_v48, %v1840_v41  ;;  %v620_v51 = vpack.c.bf16 %v616_v50, %v615_v49 }
  0xd9   : > { %v618_v52 = vpack.c.bf16 %v612_v40, %v611_v45 }
  0xda   : > { %1627 = vmatmul.mubr.msk.bf16.vlgmr.msra.gmra.mrb[0].mxu1 %vm643_vm11, %v620_v51 }
  0xdb   : > { %1623 = vmatmul.mubr.msk.bf16.vlgmr.msra.gmra.mrb[0].mxu0 %vm643_vm11, %v618_v52 }
 0x1ad   : > { %v1628_v39 = vpop.f32.mrb[0].mxu1 }
 0x1ae   : > { %v1624_v60 = vpop.f32.mrb[0].mxu0  ;;  %v722_v58 = vadd.f32 %v1628_v39, %v1575_v59  ;;  %v713_v62 = vpop.f32.mrb[1].mxu1 }
 0x1af   : > { %v706_v57 = vadd.f32 %v1624_v60, %v1575_v59  ;;  %v697_v46 = vpop.f32.mrb[1].mxu0  ;;  %v714_v0 = vadd.f32 %v1575_v59, %v713_v62  ;;  %v1629_v43 = vpop.f32.mrb[2].mxu1 }
 0x1b0   : > { %v698_v63 = vadd.f32 %v1575_v59, %v697_v46  ;;  %v1625_v1 = vpop.f32.mrb[2].mxu0  ;;  %v734_v2 = vmax.f32 %v722_v58, 0.0  ;;  %v2224_v3 = vadd.f32 %v1629_v43, %v1575_v59  ;;  %v716_v5 = vpop.f32.mrb[3].mxu1 }
 0x1b1   : > { %v730_v38 = vmax.f32 %v706_v57, 0.0  ;;  %v2222_v37 = vadd.f32 %v1625_v1, %v1575_v59  ;;  %v700_v4 = vpop.f32.mrb[3].mxu0  ;;  %v2226_v7 = vmax.f32 %v714_v0, 0.0  ;;  %v2230_v9 = vadd.f32 %v1575_v59, %v716_v5 }
 0x1b2   : > { %v728_v6 = vmax.f32 %v698_v63, 0.0  ;;  %v2228_v8 = vadd.f32 %v1575_v59, %v700_v4  ;;  %v846_v12 = vcombine.high %v734_v2, %v734_v2  ;;  %v853_v13 = vrot.slane %v734_v2, %v2220_v61 }
 0x1b3   : > { %v778_v10 = vcombine.high %v730_v38, %v730_v38  ;;  %v785_v11 = vrot.slane %v730_v38, %v2220_v61  ;;  %v812_v16 = vcombine.high %v2226_v7, %v2226_v7  ;;  %v2241_v17 = vrot.slane %v2226_v7, %v2220_v61 }
 0x1b4   : > { %v744_v14 = vcombine.high %v728_v6, %v728_v6  ;;  %v2235_v15 = vrot.slane %v728_v6, %v2220_v61  ;;  %v860_v21 = vrot.slane %v846_v12, %v2220_v61  ;;  %v861_v22 = vcombine.high %v853_v13, %v853_v13 }
 0x1b5   : > { %v792_v18 = vrot.slane %v778_v10, %v2220_v61  ;;  %v793_v19 = vcombine.high %v785_v11, %v785_v11  ;;  %v969_v20 = vsel %vm912_vm12, %v785_v11, -inf  ;;  %v1081_v25 = vsel %vm912_vm12, %v853_v13, -inf }
 0x1b6   : > { %v970_v24 = vrot.slane %v969_v20, 4  ;;  %v2248_v28 = vrot.slane %v744_v14, %v2220_v61  ;;  %v862_v26 = vcombine.high %v860_v21, %v860_v21  ;;  %v1082_v33 = vrot.slane %v1081_v25, 4 }
 0x1b7   : > { %v794_v23 = vcombine.high %v792_v18, %v792_v18  ;;  %v976_v29 = vsel %vm912_vm12, %v793_v19, -inf  ;;  %v983_v30 = vsel %vm912_vm12, %v792_v18, -inf  ;;  %v1088_v36 = vsel %vm912_vm12, %v861_v22, -inf }
 0x1b8   : > { %v971_v31 = vmax.f32 %v969_v20, %v970_v24  ;;  %v977_v27 = vrot.slane %v976_v29, 4  ;;  %v984_v32 = vrot.slane %v983_v30, 4  ;;  %v1095_v41 = vsel %vm912_vm12, %v860_v21, -inf }
 0x1b9   : > { %v990_v34 = vsel %vm912_vm12, %v794_v23, -inf  ;;  %v1102_v42 = vsel %vm912_vm12, %v862_v26, -inf  ;;  %v1083_v50 = vmax.f32 %v1081_v25, %v1082_v33  ;;  %v1089_v45 = vrot.slane %v1088_v36, 4 }
 0x1ba   : > { %v972_v44 = vrot.slane %v971_v31, 2  ;;  %v978_v47 = vmax.f32 %v976_v29, %v977_v27  ;;  %v985_v48 = vmax.f32 %v983_v30, %v984_v32  ;;  %v991_v49 = vrot.slane %v990_v34, 4 }
 0x1bb   : > { %v1096_v40 = vrot.slane %v1095_v41, 4  ;;  %v1103_v51 = vrot.slane %v1102_v42, 4  ;;  %v1084_v55 = vrot.slane %v1083_v50, 2  ;;  %v1090_v56 = vmax.f32 %v1088_v36, %v1089_v45 }
 0x1bc   : > { %v973_v52 = vmax.f32 %v971_v31, %v972_v44  ;;  %v979_v53 = vrot.slane %v978_v47, 2  ;;  %v986_v35 = vrot.slane %v985_v48, 2  ;;  %v992_v54 = vmax.f32 %v990_v34, %v991_v49 }
 0x1bd   : > { %v1097_v59 = vmax.f32 %v1095_v41, %v1096_v40  ;;  %v1104_v60 = vmax.f32 %v1102_v42, %v1103_v51  ;;  %v1085_v62 = vmax.f32 %v1083_v50, %v1084_v55  ;;  %v1091_v63 = vrot.slane %v1090_v56, 2 }
 0x1be   : > { %v974_v39 = vrot.slane %v973_v52, 1  ;;  %v980_v57 = vmax.f32 %v978_v47, %v979_v53  ;;  %v987_v58 = vmax.f32 %v985_v48, %v986_v35  ;;  %v993_v46 = vrot.slane %v992_v54, 2 }
 0x1bf   : > { %v1098_v0 = vrot.slane %v1097_v59, 2  ;;  %v1105_v1 = vrot.slane %v1104_v60, 2  ;;  %v1086_v5 = vrot.slane %v1085_v62, 1  ;;  %v1092_v6 = vmax.f32 %v1090_v56, %v1091_v63 }
 0x1c0   : > { %v2256_v43 = vmax.f32 %v973_v52, %v974_v39  ;;  %v981_v38 = vrot.slane %v980_v57, 1  ;;  %v988_v2 = vrot.slane %v987_v58, 1  ;;  %v994_v4 = vmax.f32 %v992_v54, %v993_v46 }
 0x1c1   : > { %v1099_v10 = vmax.f32 %v1097_v59, %v1098_v0  ;;  %v1106_v11 = vmax.f32 %v1104_v60, %v1105_v1  ;;  %v759_v18 = vcombine.high %v2235_v15, %v2235_v15  ;;  %v2264_v19 = vmax.f32 %v1085_v62, %v1086_v5 }
 0x1c2   : > { %v2258_v12 = vmax.f32 %v980_v57, %v981_v38  ;;  %v2260_v13 = vmax.f32 %v987_v58, %v988_v2  ;;  %v995_v14 = vrot.slane %v994_v4, 1  ;;  %v1093_v20 = vrot.slane %v1092_v6, 1 }
 0x1c3   : > { %v1100_v21 = vrot.slane %v1099_v10, 1  ;;  %v1107_v24 = vrot.slane %v1106_v11, 1  ;;  %v760_v25 = vcombine.high %v2248_v28, %v2248_v28  ;;  %v913_v23 = vsel %vm912_vm12, %v2235_v15, -inf }
 0x1c4   : > { %v2266_v22 = vmax.f32 %v994_v4, %v995_v14  ;;  %v920_v29 = vsel %vm912_vm12, %v759_v18, -inf  ;;  %v2273_v30 = vmax.f32 %v1092_v6, %v1093_v20  ;;  %v914_v27 = vrot.slane %v913_v23, 4 }
 0x1c5   : > { %v2275_v26 = vmax.f32 %v1099_v10, %v1100_v21  ;;  %v2277_v31 = vmax.f32 %v1106_v11, %v1107_v24  ;;  %v921_v32 = vrot.slane %v920_v29, 4  ;;  %v927_v33 = vsel %vm912_vm12, %v2248_v28, -inf }
 0x1c6   : > { %v934_v34 = vsel %vm912_vm12, %v760_v25, -inf  ;;  %v826_v15 = vrot.slane %v812_v16, %v2220_v61  ;;  %v915_v36 = vmax.f32 %v913_v23, %v914_v27  ;;  %v928_v41 = vrot.slane %v927_v33, 4 }
 0x1c7   : > { %v935_v42 = vrot.slane %v934_v34, 4  ;;  %v827_v44 = vcombine.high %v2241_v17, %v2241_v17  ;;  %v922_v47 = vmax.f32 %v920_v29, %v921_v32  ;;  %v1025_v49 = vsel %vm912_vm12, %v2241_v17, -inf }
 0x1c8   : > { %v828_v48 = vcombine.high %v826_v15, %v826_v15  ;;  %v1039_v28 = vsel %vm912_vm12, %v826_v15, -inf  ;;  %v916_v50 = vrot.slane %v915_v36, 2  ;;  %v929_v45 = vmax.f32 %v927_v33, %v928_v41 }
 0x1c9   : > { %v936_v40 = vmax.f32 %v934_v34, %v935_v42  ;;  %v1026_v51 = vrot.slane %v1025_v49, 4  ;;  %v923_v52 = vrot.slane %v922_v47, 2  ;;  %v1032_v7 = vsel %vm912_vm12, %v827_v44, -inf }
 0x1ca   : > { %v1040_v16 = vrot.slane %v1039_v28, 4  ;;  %v1046_v53 = vsel %vm912_vm12, %v828_v48, -inf  ;;  %v917_v35 = vmax.f32 %v915_v36, %v916_v50  ;;  %v930_v54 = vrot.slane %v929_v45, 2 }
 0x1cb   : > { %v937_v55 = vrot.slane %v936_v40, 2  ;;  %v1027_v56 = vmax.f32 %v1025_v49, %v1026_v51  ;;  %v924_v59 = vmax.f32 %v922_v47, %v923_v52  ;;  %v1033_v60 = vrot.slane %v1032_v7, 4 }
 0x1cc   : > { %v1041_v39 = vmax.f32 %v1039_v28, %v1040_v16  ;;  %v1047_v17 = vrot.slane %v1046_v53, 4  ;;  %v918_v57 = vrot.slane %v917_v35, 1  ;;  %v931_v58 = vmax.f32 %v929_v45, %v930_v54 }
 0x1cd   : > { %v938_v46 = vmax.f32 %v936_v40, %v937_v55  ;;  %v1028_v62 = vrot.slane %v1027_v56, 2  ;;  %v925_v63 = vrot.slane %v924_v59, 1  ;;  %v1034_v0 = vmax.f32 %v1032_v7, %v1033_v60 }
 0x1ce   : > { %v1042_v1 = vrot.slane %v1041_v39, 2  ;;  %v1048_v38 = vmax.f32 %v1046_v53, %v1047_v17  ;;  %v2293_v2 = vmax.f32 %v917_v35, %v918_v57  ;;  %v932_v4 = vrot.slane %v931_v58, 1 }
 0x1cf   : > { %v939_v5 = vrot.slane %v938_v46, 1  ;;  %v1029_v6 = vmax.f32 %v1027_v56, %v1028_v62  ;;  %v2295_v10 = vmax.f32 %v924_v59, %v925_v63  ;;  %v1035_v11 = vrot.slane %v1034_v0, 2 }
 0x1d0   : > { %v1043_v14 = vmax.f32 %v1041_v39, %v1042_v1  ;;  %v1049_v18 = vrot.slane %v1048_v38, 2  ;;  %v2297_v20 = vmax.f32 %v931_v58, %v932_v4  ;;  %v731_v25 = vmax.f32 %v2222_v37, 0.0 }
 0x1d1   : > { %v2299_v21 = vmax.f32 %v938_v46, %v939_v5  ;;  %v1030_v24 = vrot.slane %v1029_v6, 1  ;;  %v1036_v23 = vmax.f32 %v1034_v0, %v1035_v11  ;;  %v735_v32 = vmax.f32 %v2224_v3, 0.0 }
 0x1d2   : > { %v1044_v29 = vrot.slane %v1043_v14, 1  ;;  %v1050_v27 = vmax.f32 %v1048_v38, %v1049_v18  ;;  %v795_v34 = vcombine.high %v731_v25, %v731_v25  ;;  %v802_v15 = vrot.slane %v731_v25, %v2220_v61 }
 0x1d3   : > { %v2303_v33 = vmax.f32 %v1029_v6, %v1030_v24  ;;  %v2307_v36 = vmax.f32 %v2228_v8, 0.0  ;;  %v1037_v41 = vrot.slane %v1036_v23, 1  ;;  %v863_v47 = vcombine.high %v735_v32, %v735_v32 }
 0x1d4   : > { %v2309_v42 = vmax.f32 %v1043_v14, %v1044_v29  ;;  %v1051_v44 = vrot.slane %v1050_v27, 1  ;;  %v809_v37 = vrot.slane %v795_v34, %v2220_v61  ;;  %v810_v48 = vcombine.high %v802_v15, %v802_v15 }
 0x1d5   : > { %v997_v49 = vsel %vm912_vm12, %v802_v15, -inf  ;;  %v870_v3 = vrot.slane %v735_v32, %v2220_v61  ;;  %v2314_v28 = vmax.f32 %v1036_v23, %v1037_v41  ;;  %v877_v8 = vrot.slane %v863_v47, %v2220_v61 }
 0x1d6   : > { %v2316_v50 = vmax.f32 %v1050_v27, %v1051_v44  ;;  %v998_v45 = vrot.slane %v997_v49, 4  ;;  %v811_v40 = vcombine.high %v809_v37, %v809_v37  ;;  %v1004_v51 = vsel %vm912_vm12, %v810_v48, -inf }
 0x1d7   : > { %v1011_v52 = vsel %vm912_vm12, %v809_v37, -inf  ;;  %v878_v7 = vcombine.high %v870_v3, %v870_v3  ;;  %v1005_v53 = vrot.slane %v1004_v51, 4  ;;  %v879_v54 = vcombine.high %v877_v8, %v877_v8 }
 0x1d8   : > { %v999_v16 = vmax.f32 %v997_v49, %v998_v45  ;;  %v1012_v35 = vrot.slane %v1011_v52, 4  ;;  %v1018_v55 = vsel %vm912_vm12, %v811_v40, -inf  ;;  %v1109_v56 = vsel %vm912_vm12, %v870_v3, -inf }
 0x1d9   : > { %v1116_v59 = vsel %vm912_vm12, %v878_v7, -inf  ;;  %v1123_v60 = vsel %vm912_vm12, %v877_v8, -inf  ;;  %v1006_v17 = vmax.f32 %v1004_v51, %v1005_v53  ;;  %v1019_v58 = vrot.slane %v1018_v55, 4 }
 0x1da   : > { %v1000_v39 = vrot.slane %v999_v16, 2  ;;  %v1013_v57 = vmax.f32 %v1011_v52, %v1012_v35  ;;  %v1110_v46 = vrot.slane %v1109_v56, 4  ;;  %v1117_v62 = vrot.slane %v1116_v59, 4 }
 0x1db   : > { %v1124_v63 = vrot.slane %v1123_v60, 4  ;;  %v1130_v0 = vsel %vm912_vm12, %v879_v54, -inf  ;;  %v1007_v38 = vrot.slane %v1006_v17, 2  ;;  %v1020_v5 = vmax.f32 %v1018_v55, %v1019_v58 }
 0x1dc   : > { %v1001_v1 = vmax.f32 %v999_v16, %v1000_v39  ;;  %v1014_v4 = vrot.slane %v1013_v57, 2  ;;  %v1111_v6 = vmax.f32 %v1109_v56, %v1110_v46  ;;  %v1118_v11 = vmax.f32 %v1116_v59, %v1117_v62 }
 0x1dd   : > { %v1125_v14 = vmax.f32 %v1123_v60, %v1124_v63  ;;  %v1131_v18 = vrot.slane %v1130_v0, 4  ;;  %v1008_v25 = vmax.f32 %v1006_v17, %v1007_v38  ;;  %v1021_v29 = vrot.slane %v1020_v5, 2 }
 0x1de   : > { %v1002_v24 = vrot.slane %v1001_v1, 1  ;;  %v1015_v23 = vmax.f32 %v1013_v57, %v1014_v4  ;;  %v1112_v27 = vrot.slane %v1111_v6, 2  ;;  %v1119_v32 = vrot.slane %v1118_v11, 2 }
 0x1df   : > { %v1126_v34 = vrot.slane %v1125_v14, 2  ;;  %v1132_v15 = vmax.f32 %v1130_v0, %v1131_v18  ;;  %v1009_v44 = vrot.slane %v1008_v25, 1  ;;  %v1022_v37 = vmax.f32 %v1020_v5, %v1021_v29 }
 0x1e0   : > { %v1003_v41 = vmax.f32 %v1001_v1, %v1002_v24  ;;  %v1016_v47 = vrot.slane %v1015_v23, 1  ;;  %v1113_v48 = vmax.f32 %v1111_v6, %v1112_v27  ;;  %v1120_v49 = vmax.f32 %v1118_v11, %v1119_v32 }
 0x1e1   : > { %v1127_v3 = vmax.f32 %v1125_v14, %v1126_v34  ;;  %v1133_v45 = vrot.slane %v1132_v15, 2  ;;  %v1010_v8 = vmax.f32 %v1008_v25, %v1009_v44  ;;  %v1023_v51 = vrot.slane %v1022_v37, 1 }
 0x1e2   : > { %v1017_v40 = vmax.f32 %v1015_v23, %v1016_v47  ;;  %v1141_v52 = vmax.f32 %v2256_v43, %v1003_v41  ;;  %v1114_v7 = vrot.slane %v1113_v48, 1  ;;  %v1121_v16 = vrot.slane %v1120_v49, 1 }
 0x1e3   : > { %v1128_v53 = vrot.slane %v1127_v3, 1  ;;  %v1134_v35 = vmax.f32 %v1132_v15, %v1133_v45  ;;  %v1024_v54 = vmax.f32 %v1022_v37, %v1023_v51  ;;  %v1142_v55 = vmax.f32 %v2258_v12, %v1010_v8 }
 0x1e4   : > { %v1143_v56 = vmax.f32 %v2260_v13, %v1017_v40  ;;  %v1157_v59 = vpack.c.bf16 %v1141_v52, %v1141_v52  ;;  %v1115_v60 = vmax.f32 %v1113_v48, %v1114_v7  ;;  %v1122_v39 = vmax.f32 %v1120_v49, %v1121_v16 }
 0x1e5   : > { %v1129_v17 = vmax.f32 %v1127_v3, %v1128_v53  ;;  %v1135_v57 = vrot.slane %v1134_v35, 1  ;;  %v1144_v58 = vmax.f32 %v2266_v22, %v1024_v54  ;;  %v1158_v46 = vpack.c.bf16 %v1142_v55, %v1142_v55 }
 0x1e6   : > { %v1159_v62 = vpack.c.bf16 %v1143_v56, %v1143_v56  ;;  %v1219_v43 = vrot.slane %v1157_v59, %v2220_v61  ;;  %v1149_v0 = vmax.f32 %v2264_v19, %v1115_v60  ;;  %v1150_v12 = vmax.f32 %v2273_v30, %v1122_v39 }
 0x1e7   : > { %v1136_v63 = vmax.f32 %v1134_v35, %v1135_v57  ;;  %v1151_v13 = vmax.f32 %v2275_v26, %v1129_v17  ;;  %v1160_v1 = vpack.c.bf16 %v1144_v58, %v1144_v58  ;;  %v1226_v38 = vrot.slane %v1158_v46, %v2220_v61 }
 0x1e8   : > { %v1233_v4 = vrot.slane %v1159_v62, %v2220_v61  ;;  %v1331_v5 = vrot.slane %v1219_v43, %v2220_v61  ;;  %v1165_v6 = vpack.c.bf16 %v1149_v0, %v1149_v0  ;;  %v1166_v11 = vpack.c.bf16 %v1150_v12, %v1150_v12 }
 0x1e9   : > { %v1152_v22 = vmax.f32 %v2277_v31, %v1136_v63  ;;  %v1167_v14 = vpack.c.bf16 %v1151_v13, %v1151_v13  ;;  %v1240_v18 = vrot.slane %v1160_v1, %v2220_v61  ;;  %v1338_v19 = vrot.slane %v1226_v38, %v2220_v61 }
 0x1ea   : > { %v1345_v30 = vrot.slane %v1233_v4, %v2220_v61  ;;  %v1413_v24 = vunpack.c.l.b16 %v1331_v5  ;;  %v1275_v25 = vrot.slane %v1165_v6, %v2220_v61  ;;  %v1282_v23 = vrot.slane %v1166_v11, %v2220_v61 }
 0x1eb   : > { %v1168_v26 = vpack.c.bf16 %v1152_v22, %v1152_v22  ;;  %v1289_v29 = vrot.slane %v1167_v14, %v2220_v61  ;;  %v1352_v31 = vrot.slane %v1240_v18, %v2220_v61  ;;  %v1414_v27 = vunpack.c.l.b16 %v1338_v19 }
 0x1ec   : > { %v1415_v32 = vunpack.c.l.b16 %v1345_v30  ;;  %v761_v34 = vcombine.high %v2307_v36, %v2307_v36  ;;  %v1387_v41 = vrot.slane %v1275_v25, %v2220_v61  ;;  %v1394_v44 = vrot.slane %v1282_v23, %v2220_v61 }
 0x1ed   : > { %v1296_v15 = vrot.slane %v1168_v26, %v2220_v61  ;;  %v1401_v47 = vrot.slane %v1289_v29, %v2220_v61  ;;  %v1416_v37 = vunpack.c.l.b16 %v1352_v31  ;;  %v1434_v48 = vrot.slane %v1414_v27, 7 }
 0x1ee   : > { %v1436_v49 = vrot.slane %v1415_v32, 6  ;;  %v768_v3 = vrot.slane %v2307_v36, %v2220_v61  ;;  %v1421_v8 = vunpack.c.l.b16 %v1387_v41  ;;  %v1422_v40 = vunpack.c.l.b16 %v1394_v44 }
 0x1ef   : > { %v1408_v45 = vrot.slane %v1296_v15, %v2220_v61  ;;  %v1423_v51 = vunpack.c.l.b16 %v1401_v47  ;;  %v1435_v52 = vsel %vm1426_vm13, %v1434_v48, %v1413_v24  ;;  %v1438_v7 = vrot.slane %v1416_v37, 5 }
 0x1f0   : > { %v775_v16 = vrot.slane %v761_v34, %v2220_v61  ;;  %v776_v53 = vcombine.high %v768_v3, %v768_v3  ;;  %v1437_v35 = vsel %vm1429_vm14, %v1436_v49, %v1435_v52  ;;  %v1446_v55 = vrot.slane %v1422_v40, 7 }
 0x1f1   : > { %v1424_v54 = vunpack.c.l.b16 %v1408_v45  ;;  %v1448_v56 = vrot.slane %v1423_v51, 6  ;;  %v941_v36 = vsel %vm912_vm12, %v768_v3, -inf  ;;  %v733_v0 = vmax.f32 %v2230_v9, 0.0 }
 0x1f2   : > { %v777_v59 = vcombine.high %v775_v16, %v775_v16  ;;  %v948_v60 = vsel %vm912_vm12, %v776_v53, -inf  ;;  %v955_v39 = vsel %vm912_vm12, %v775_v16, -inf  ;;  %v1447_v17 = vsel %vm1426_vm13, %v1446_v55, %v1421_v8 }
 0x1f3   : > { %v1450_v57 = vrot.slane %v1424_v54, 5  ;;  %v942_v58 = vrot.slane %v941_v36, 4  ;;  %v949_v46 = vrot.slane %v948_v60, 4  ;;  %v1449_v62 = vsel %vm1429_vm14, %v1448_v56, %v1447_v17 }
 0x1f4   : > { %v956_v43 = vrot.slane %v955_v39, 4  ;;  %v962_v63 = vsel %vm912_vm12, %v777_v59, -inf  ;;  %v1439_v38 = vsel %vm1432_vm15, %v1438_v7, %v1437_v35  ;;  %v829_v5 = vcombine.high %v733_v0, %v733_v0 }
 0x1f5   : > { %v943_v12 = vmax.f32 %v941_v36, %v942_v58  ;;  %v950_v13 = vmax.f32 %v948_v60, %v949_v46  ;;  %v963_v1 = vrot.slane %v962_v63, 4  ;;  %v836_v22 = vrot.slane %v733_v0, %v2220_v61 }
 0x1f6   : > { %v957_v4 = vmax.f32 %v955_v39, %v956_v43  ;;  %v2370_v6 = vsel %vm1432_vm15, %v1450_v57, %v1449_v62  ;;  %v1453_v19 = vpack.c.b16 %v1439_v38, %v1439_v38  ;;  %v843_v24 = vrot.slane %v829_v5, %v2220_v61 }
 0x1f7   : > { %v944_v11 = vrot.slane %v943_v12, 2  ;;  %v951_v14 = vrot.slane %v950_v13, 2  ;;  %v964_v18 = vmax.f32 %v962_v63, %v963_v1  ;;  %v844_v9 = vcombine.high %v836_v22, %v836_v22 }
 0x1f8   : > { %v958_v30 = vrot.slane %v957_v4, 2  ;;  %v1053_v26 = vsel %vm912_vm12, %v836_v22, -inf  ;;  %1583 = vst.sshfl [vmem:[%s2374_s27 + $0x2] sm:$0x3 pattern:$0x76325410] %v1453_v19  ;;  %v845_v32 = vcombine.high %v843_v24, %v843_v24 }
 0x1f9   : > { %v945_v25 = vmax.f32 %v943_v12, %v944_v11  ;;  %v952_v23 = vmax.f32 %v950_v13, %v951_v14  ;;  %v965_v29 = vrot.slane %v964_v18, 2  ;;  %v1054_v31 = vrot.slane %v1053_v26, 4 }
 0x1fa   : > { %v959_v27 = vmax.f32 %v957_v4, %v958_v30  ;;  %v1060_v34 = vsel %vm912_vm12, %v844_v9, -inf  ;;  %v1067_v15 = vsel %vm912_vm12, %v843_v24, -inf  ;;  %v1074_v45 = vsel %vm912_vm12, %v845_v32, -inf }
 0x1fb   : > { %v946_v41 = vrot.slane %v945_v25, 1  ;;  %v953_v44 = vrot.slane %v952_v23, 1  ;;  %v966_v47 = vmax.f32 %v964_v18, %v965_v29  ;;  %v1055_v37 = vmax.f32 %v1053_v26, %v1054_v31 }
 0x1fc   : > { %v960_v48 = vrot.slane %v959_v27, 1  ;;  %v1061_v49 = vrot.slane %v1060_v34, 4  ;;  %v1068_v3 = vrot.slane %v1067_v15, 4  ;;  %v1075_v35 = vrot.slane %v1074_v45, 4 }
 0x1fd   : > { %v947_v8 = vmax.f32 %v945_v25, %v946_v41  ;;  %v954_v40 = vmax.f32 %v952_v23, %v953_v44  ;;  %v967_v51 = vrot.slane %v966_v47, 1  ;;  %v1056_v52 = vrot.slane %v1055_v37, 2 }
 0x1fe   : > { %v961_v7 = vmax.f32 %v959_v27, %v960_v48  ;;  %v1062_v16 = vmax.f32 %v1060_v34, %v1061_v49  ;;  %v1069_v53 = vmax.f32 %v1067_v15, %v1068_v3  ;;  %v1076_v17 = vmax.f32 %v1074_v45, %v1075_v35 }
 0x1ff   : > { %v968_v54 = vmax.f32 %v966_v47, %v967_v51  ;;  %v1137_v55 = vmax.f32 %v2293_v2, %v947_v8  ;;  %v1138_v56 = vmax.f32 %v2295_v10, %v954_v40  ;;  %v1057_v59 = vmax.f32 %v1055_v37, %v1056_v52 }
 0x200   : > { %v1139_v36 = vmax.f32 %v2297_v20, %v961_v7  ;;  %v1063_v60 = vrot.slane %v1062_v16, 2  ;;  %v1070_v39 = vrot.slane %v1069_v53, 2  ;;  %v1077_v12 = vrot.slane %v1076_v17, 2 }
 0x201   : > { %v1140_v57 = vmax.f32 %v2299_v21, %v968_v54  ;;  %v1153_v58 = vpack.c.bf16 %v1137_v55, %v1137_v55  ;;  %v1154_v46 = vpack.c.bf16 %v1138_v56, %v1138_v56  ;;  %v1058_v62 = vrot.slane %v1057_v59, 1 }
 0x202   : > { %v1155_v43 = vpack.c.bf16 %v1139_v36, %v1139_v36  ;;  %v1064_v63 = vmax.f32 %v1062_v16, %v1063_v60  ;;  %v1071_v0 = vmax.f32 %v1069_v53, %v1070_v39  ;;  %v1078_v5 = vmax.f32 %v1076_v17, %v1077_v12 }
 0x203   : > { %v1156_v13 = vpack.c.bf16 %v1140_v57, %v1140_v57  ;;  %v1191_v2 = vrot.slane %v1153_v58, %v2220_v61  ;;  %v1198_v10 = vrot.slane %v1154_v46, %v2220_v61  ;;  %v1059_v1 = vmax.f32 %v1057_v59, %v1058_v62 }
 0x204   : > { %v1205_v20 = vrot.slane %v1155_v43, %v2220_v61  ;;  %v1065_v38 = vrot.slane %v1064_v63, 1  ;;  %v1072_v4 = vrot.slane %v1071_v0, 1  ;;  %v1079_v24 = vrot.slane %v1078_v5, 1 }
 0x205   : > { %v1212_v21 = vrot.slane %v1156_v13, %v2220_v61  ;;  %v1303_v22 = vrot.slane %v1191_v2, %v2220_v61  ;;  %v1310_v11 = vrot.slane %v1198_v10, %v2220_v61  ;;  %v1145_v14 = vmax.f32 %v2303_v33, %v1059_v1 }
 0x206   : > { %v1317_v18 = vrot.slane %v1205_v20, %v2220_v61  ;;  %v1066_v19 = vmax.f32 %v1064_v63, %v1065_v38  ;;  %v1073_v30 = vmax.f32 %v1071_v0, %v1072_v4  ;;  %v1080_v31 = vmax.f32 %v1078_v5, %v1079_v24 }
 0x207   : > { %v1324_v9 = vrot.slane %v1212_v21, %v2220_v61  ;;  %v1409_v26 = vunpack.c.l.b16 %v1303_v22  ;;  %v1410_v25 = vunpack.c.l.b16 %v1310_v11  ;;  %v1161_v23 = vpack.c.bf16 %v1145_v14, %v1145_v14 }
 0x208   : > { %v1411_v29 = vunpack.c.l.b16 %v1317_v18  ;;  %v1146_v27 = vmax.f32 %v2314_v28, %v1066_v19  ;;  %v1147_v32 = vmax.f32 %v2309_v42, %v1073_v30  ;;  %v1455_v41 = vpack.c.b16 %v2370_v6, %v2370_v6 }
 0x209   : > { %v1412_v34 = vunpack.c.l.b16 %v1324_v9  ;;  %v1425_v15 = vrot.slane %v1410_v25, 7  ;;  %v1247_v33 = vrot.slane %v1161_v23, %v2220_v61  ;;  %v1148_v47 = vmax.f32 %v2316_v50, %v1080_v31 }
 0x20a   : > { %v1428_v44 = vrot.slane %v1411_v29, 6  ;;  %v1162_v37 = vpack.c.bf16 %v1146_v27, %v1146_v27  ;;  %v1163_v48 = vpack.c.bf16 %v1147_v32, %v1147_v32  ;;  %1585 = vst.sshfl [vmem:[%s2374_s27 + $0x6] sm:$0x3 pattern:$0x76325410] %v1455_v41 }
 0x20b   : > { %v1427_v49 = vsel %vm1426_vm13, %v1425_v15, %v1409_v26  ;;  %v1431_v3 = vrot.slane %v1412_v34, 5  ;;  %v1164_v42 = vpack.c.bf16 %v1148_v47, %v1148_v47  ;;  %v1359_v6 = vrot.slane %v1247_v33, %v2220_v61 }
 0x20c   : > { %v1430_v28 = vsel %vm1429_vm14, %v1428_v44, %v1427_v49  ;;  %v1254_v45 = vrot.slane %v1162_v37, %v2220_v61  ;;  %v1261_v8 = vrot.slane %v1163_v48, %v2220_v61 }
 0x20d   : > { %v1433_v50 = vsel %vm1432_vm15, %v1431_v3, %v1430_v28  ;;  %v1268_v40 = vrot.slane %v1164_v42, %v2220_v61  ;;  %v1417_v54 = vunpack.c.l.b16 %v1359_v6 }
 0x20e   : > { %v1366_v51 = vrot.slane %v1254_v45, %v2220_v61  ;;  %v1373_v52 = vrot.slane %v1261_v8, %v2220_v61  ;;  %v1452_v7 = vpack.c.b16 %v1433_v50, %v1433_v50 }
 0x20f   : > { %v1380_v16 = vrot.slane %v1268_v40, %v2220_v61 }
 0x210   : > { %v1418_v53 = vunpack.c.l.b16 %v1366_v51  ;;  %v1419_v35 = vunpack.c.l.b16 %v1373_v52  ;;  %1582 = vst.sshfl [vmem:[%s2374_s27] sm:$0x3 pattern:$0x76325410] %v1452_v7 }
 0x211   : > { %v1420_v55 = vunpack.c.l.b16 %v1380_v16 }
 0x212   : > { %v1440_v56 = vrot.slane %v1418_v53, 7  ;;  %v1442_v59 = vrot.slane %v1419_v35, 6 }
 0x213   : > { %v1444_v60 = vrot.slane %v1420_v55, 5 }
 0x214   : > { %v1441_v36 = vsel %vm1426_vm13, %v1440_v56, %v1417_v54 }
 0x215   : > { %v1443_v39 = vsel %vm1429_vm14, %v1442_v59, %v1441_v36 }
 0x216   : > { %v1445_v17 = vsel %vm1432_vm15, %v1444_v60, %v1443_v39 }
 0x217   : > { %v1454_v61 = vpack.c.b16 %v1445_v17, %v1445_v17 }
 0x219   : > { %1584 = vst.sshfl [vmem:[%s2374_s27 + $0x4] sm:$0x3 pattern:$0x76325410] %v1454_v61 }
 0x21a   : > { %1861 = shalt.err (!%p1858_p3)
}
 0x21b   : > { %s1862_s10 = scalar_lea.hbm %s2419_s5, 128  ;;  %s1866_s19 = scalar_lea.hbm %s2470_s3, 256 }
 0x21c   : > { %p1863_p4 = scmp.ne.s32.totalorder %s2419_s5, %s1862_s10  ;;  %p1867_p9 = scmp.lt.u32.totalorder %s2419_s5, %s2470_s3 }
 0x21d   : > { %p1868_p10 = scmp.lt.u32.totalorder %s1866_s19, %s1862_s10  ;;  %p1870_p12 = scmp.lt.u32.totalorder %s1862_s10, %s2419_s5 }
 0x21e   : > { %p1864_p7 = pnand %p1863_p4, %p1984_p5 }
 0x21f   : > { %p1869_p11 = por %p1868_p10, %p1867_p9 }
 0x220   : > { %p1865_p8 = pneg %p1864_p7 }
 0x221   : > { %p1871_p13 = por %p1870_p12, %p1869_p11 }
 0x223   : > { %p1872_p0 = pnand %p1871_p13, %p1865_p8 }
 0x225   : > { %1875 = shalt.err (!%p1872_p0)
}
 0x226   : > { %s1924_s25 = smov 32   ;;  %s1925_s26 = smov 2  }
 0x227   : > { %1634 = dma.vmem_to_hbm [thread:$0]  (%p1984_p5), %s2421_s29, 128, %s2419_s5, %s2426_s16, %s1924_s25, %s1924_s25, %s1925_s26  }
 0x228 PF: > { %p1640_p1 = scmp.ge.s32.totalorder %s1910_s15, 2  ;;  %s1521_s27 = sand.u32 1, %s1898_s12  }
 0x229   : > { %s1522_s28 = scalar_lea.sflag [#allocation4], %s1521_s27 }
 0x22a   : > { %p1637_p2 = pnand %p1640_p1, %p1988_p6 }
 0x22c   : > { %1893 = dma.done.wait (!%p1637_p2), %s1522_s28, 128  }
 0x22d   : > { %1895 = vsyncadd (!%p1637_p2), %s1522_s28, 4294967168  ;;  %p13_p3 = scmp.ge.s32.totalorder %s1971_s18, 4   ;;  %s2473_s12 = smov %s1902_s13 }
 0x22e   : > { %s2474_s13 = smov %s1906_s14  ;;  %s2475_s14 = smov %s1982_s21 }
 0x22f   : > { %s2476_s15 = smov %s1971_s18  ;;  %15 = sbr.rel (!%p13_p3) target bundleno = 3 (0x3), region = 69 }
 0x236   :  { %1527 = vsyncpa [#allocation4], 1 }
 0x237   :  { %1529 = vsyncpa [#allocation4 + $0x1], 1 }

</bundles_post_ra>
